<compile_context>
chip_gen: v7x
topology: tpu7x:2x2x1
jax: 0.10.0
libtpu: 0.0.40
codegen_flags: <defaults>
</compile_context>

<pallas_src>
import math

import jax
import jax.numpy as jnp
from jax import lax
from jax.experimental import pallas as pl
from jax.experimental.pallas import tpu as pltpu


def _pad(d, m):
    return ((d + m - 1) // m) * m


def _vmem_estimate(tile_sx, Sy, n_in, n_out, Dx, Dy, in_isz, out_isz):
    """Rough double-buffered VMEM footprint for one grid step (bytes)."""
    x_blk = _pad(tile_sx, 8) * _pad(n_in, 128) * in_isz
    y_blk = _pad(Sy, 8) * _pad(n_in, 128) * in_isz
    w_blk = n_out * _pad(Dx, 8) * _pad(Dy, 128) * in_isz
    o_blk = n_out * _pad(tile_sx, 8) * _pad(Sy, 128) * out_isz
    scratch = _pad(tile_sx, 8) * _pad(Dy, 128) * 4  # per-channel xw intermediate
    return 2 * (x_blk + y_blk + w_blk + o_blk) + scratch


def _pick_sx_tile(Sx, Sy, n_in, n_out, Dx, Dy, in_isz, out_isz,
                  budget=24 * 1024 * 1024):
    """Largest Sx tile (multiple of 8, or full Sx) whose blocks fit the budget."""
    cands = sorted(
        {Sx} | {t for t in (8, 16, 32, 64, 128, 256, 512, 1024)
                if t < Sx and Sx % t == 0},
        reverse=True)
    for t in cands:
        if _vmem_estimate(t, Sy, n_in, n_out, Dx, Dy, in_isz, out_isz) <= budget:
            return t
    return cands[-1]


def _make_biaffine_kernel(n_in, n_out, bias_x, bias_y):
    def kernel(x_ref, w_ref, y_ref, o_ref):
        # x_ref: [1, Tsx, n_in]   current (batch, Sx-tile) slice
        # w_ref: [n_out, Dx, Dy]  full weight, resident across the whole grid
        # y_ref: [1, Sy, n_in]    current batch slice
        # o_ref: [1, n_out, Tsx, Sy]
        x = x_ref[0]                                   # [Tsx, n_in]
        y = y_ref[0]                                   # [Sy, n_in]
        for o in range(n_out):                         # small static unroll
            w = w_ref[o]                               # [Dx, Dy]
            # xw = [x, 1] @ W[o]  (bias_x row applied as a broadcast add)
            xw = jnp.dot(x, w[:n_in, :], preferred_element_type=jnp.float32)
            if bias_x:
                xw = xw + w[n_in:n_in + 1, :]          # [1, Dy] broadcast
            # s = xw[:, :n_in] @ y^T  (NT contraction, no transpose materialized)
            s = lax.dot_general(
                xw[:, :n_in].astype(y.dtype), y,
                dimension_numbers=(((1,), (1,)), ((), ())),
                preferred_element_type=jnp.float32)    # [Tsx, Sy]
            if bias_y:
                s = s + xw[:, n_in:n_in + 1]           # [Tsx, 1] broadcast
            o_ref[0, o] = s.astype(o_ref.dtype)
    return kernel


def biaffine_forward(x, y, weight, *, bias_x=True, bias_y=True,
                     channels_last=True):
    """x: [B, Sx, n_in], y: [B, Sy, n_in], weight: [n_out, Dx, Dy]."""
    B, Sx, n_in = x.shape
    By, Sy, n_in_y = y.shape
    assert By == B and n_in_y == n_in
    n_out, Dx, Dy = weight.shape
    assert Dx == n_in + int(bias_x) and Dy == n_in + int(bias_y), weight.shape

    out_dtype = jnp.promote_types(jnp.promote_types(x.dtype, y.dtype),
                                  weight.dtype)
    in_isz = max(jnp.dtype(x.dtype).itemsize, jnp.dtype(weight.dtype).itemsize)
    out_isz = jnp.dtype(out_dtype).itemsize

    tile_sx = _pick_sx_tile(Sx, Sy, n_in, n_out, Dx, Dy, in_isz, out_isz)
    n_tiles = Sx // tile_sx

    est = _vmem_estimate(tile_sx, Sy, n_in, n_out, Dx, Dy, in_isz, out_isz)
    vmem_limit = int(min(max(2 * est, 32 * 1024 * 1024), 64 * 1024 * 1024))

    kernel = _make_biaffine_kernel(n_in, n_out, bias_x, bias_y)

    out_boxy = pl.pallas_call(
        kernel,
        out_shape=jax.ShapeDtypeStruct((B, n_out, Sx, Sy), out_dtype),
        grid_spec=pltpu.PrefetchScalarGridSpec(
            num_scalar_prefetch=0,
            grid=(B, n_tiles),
            in_specs=[
                # x tile changes every step
                pl.BlockSpec((1, tile_sx, n_in), lambda b, i: (b, i, 0)),
                # full weight, constant block index -> DMA'd once for the grid
                pl.BlockSpec((n_out, Dx, Dy), lambda b, i: (0, 0, 0)),
                # y changes only with the batch index (outer axis)
                pl.BlockSpec((1, Sy, n_in), lambda b, i: (b, 0, 0)),
            ],
            out_specs=pl.BlockSpec((1, n_out, tile_sx, Sy),
                                   lambda b, i: (b, 0, i, 0)),
        ),
        compiler_params=pltpu.CompilerParams(
            dimension_semantics=("parallel", "parallel"),
            vmem_limit_bytes=vmem_limit,
        ),
    )(x, weight, y)

    if channels_last:
        # boxy -> bxyo, matches torch .permute(0, 2, 3, 1)
        return jnp.transpose(out_boxy, (0, 2, 3, 1))
    return out_boxy


def xavier_normal(key, shape, dtype=jnp.float32):
    # PyTorch xavier_normal_ on a 3D tensor (n_out, Dx, Dy):
    #   fan_in = Dx * Dy, fan_out = n_out * Dy
    n_out, dx, dy = shape
    fan_in = dx * dy
    fan_out = n_out * dy
    std = math.sqrt(2.0 / (fan_in + fan_out))
    return std * jax.random.normal(key, shape, dtype)


if __name__ == "__main__":
    # Small, module-consistent shapes.
    B, S, n_in, n_out = 2, 8, 32, 4
    bias_x, bias_y = True, True
    Dx = n_in + int(bias_x)
    Dy = n_in + int(bias_y)

    key = jax.random.PRNGKey(0)
    kx, ky, kw = jax.random.split(key, 3)
    x = jax.random.normal(kx, (B, S, n_in), dtype=jnp.float32)
    y = jax.random.normal(ky, (B, S, n_in), dtype=jnp.float32)
    weight = xavier_normal(kw, (n_out, Dx, Dy))

    out = biaffine_forward(x, y, weight, bias_x=bias_x, bias_y=bias_y)
    out = jax.block_until_ready(out)

    # Reference check (plain JAX einsum, mirrors the PyTorch module exactly).
    xb = jnp.concatenate([x, jnp.ones_like(x[..., :1])], axis=-1)
    yb = jnp.concatenate([y, jnp.ones_like(y[..., :1])], axis=-1)
    ref = jnp.einsum('bxi,oij,byj->boxy', xb, weight, yb).transpose(0, 2, 3, 1)

    assert out.shape == (B, S, S, n_out), out.shape
    assert jnp.allclose(out, ref, atol=1e-4, rtol=1e-4)
    print("KERNEL_OK")
</pallas_src>

<mosaic_0001>
module attributes {stable_mosaic.version = 11 : i64} {
  func.func @kernel(%arg0: i32, %arg1: i32, %arg2: memref<1x8x32xf32, #tpu.memory_space<vmem>>, %arg3: memref<4x33x33xf32, #tpu.memory_space<vmem>>, %arg4: memref<1x8x32xf32, #tpu.memory_space<vmem>>, %arg5: memref<1x4x8x8xf32, #tpu.memory_space<vmem>>) attributes {dimension_semantics = [#tpu.dimension_semantics<parallel>, #tpu.dimension_semantics<parallel>], iteration_bounds = array<i64: 2, 1>, scalar_prefetch = 0 : i64, scratch_operands = 0 : i64, tpu.core_type = #tpu.core_type<tc>, window_params = [{transform_indices = @transform_0, window_bounds = array<i64: 1, 8, 32>}, {pipeline_mode = #tpu.pipeline_mode<synchronous>, transform_indices = @transform_1, window_bounds = array<i64: 4, 33, 33>}, {transform_indices = @transform_2, window_bounds = array<i64: 1, 8, 32>}, {transform_indices = @transform_3, window_bounds = array<i64: 1, 4, 8, 8>}]} {
    %c0 = arith.constant 0 : index
    %c0_0 = arith.constant 0 : index
    %c0_1 = arith.constant 0 : index
    %0 = vector.load %arg2[%c0, %c0_0, %c0_1] : memref<1x8x32xf32, #tpu.memory_space<vmem>>, vector<1x8x32xf32>
    %1 = vector.shape_cast %0 : vector<1x8x32xf32> to vector<8x32xf32>
    %c0_2 = arith.constant 0 : index
    %c0_3 = arith.constant 0 : index
    %c0_4 = arith.constant 0 : index
    %2 = vector.load %arg4[%c0_2, %c0_3, %c0_4] : memref<1x8x32xf32, #tpu.memory_space<vmem>>, vector<1x8x32xf32>
    %3 = vector.shape_cast %2 : vector<1x8x32xf32> to vector<8x32xf32>
    %c0_5 = arith.constant 0 : index
    %c0_6 = arith.constant 0 : index
    %c0_7 = arith.constant 0 : index
    %4 = vector.load %arg3[%c0_5, %c0_6, %c0_7] : memref<4x33x33xf32, #tpu.memory_space<vmem>>, vector<1x33x33xf32>
    %5 = vector.shape_cast %4 : vector<1x33x33xf32> to vector<33x33xf32>
    %6 = vector.extract_strided_slice %5 {offsets = [0, 0], sizes = [32, 33], strides = [1, 1]} : vector<33x33xf32> to vector<32x33xf32>
    %cst = arith.constant dense<0.000000e+00> : vector<8x33xf32>
    %7 = tpu.matmul %1, %6, %cst {dimension_numbers = #tpu.dot_dimension_numbers<[1], [0], [0], [1], [0, 0, 1, 1], [], []>} : vector<8x32xf32>, vector<32x33xf32>, vector<8x33xf32> -> vector<8x33xf32>
    %8 = vector.extract_strided_slice %5 {offsets = [32, 0], sizes = [1, 33], strides = [1, 1]} : vector<33x33xf32> to vector<1x33xf32>
    %9 = vector.broadcast %8 : vector<1x33xf32> to vector<8x33xf32>
    %10 = arith.addf %7, %9 : vector<8x33xf32>
    %11 = vector.extract_strided_slice %10 {offsets = [0, 0], sizes = [8, 32], strides = [1, 1]} : vector<8x33xf32> to vector<8x32xf32>
    %cst_8 = arith.constant dense<0.000000e+00> : vector<8x8xf32>
    %12 = tpu.matmul %11, %3, %cst_8 {dimension_numbers = #tpu.dot_dimension_numbers<[1], [1], [0], [0], [0, 0, 1, 0], [], []>} : vector<8x32xf32>, vector<8x32xf32>, vector<8x8xf32> -> vector<8x8xf32>
    %13 = vector.extract_strided_slice %10 {offsets = [0, 32], sizes = [8, 1], strides = [1, 1]} : vector<8x33xf32> to vector<8x1xf32>
    %14 = vector.broadcast %13 : vector<8x1xf32> to vector<8x8xf32>
    %15 = arith.addf %12, %14 : vector<8x8xf32>
    %c0_9 = arith.constant 0 : index
    %c0_10 = arith.constant 0 : index
    %c0_11 = arith.constant 0 : index
    %c0_12 = arith.constant 0 : index
    %16 = vector.load %arg5[%c0_9, %c0_10, %c0_11, %c0_12] : memref<1x4x8x8xf32, #tpu.memory_space<vmem>>, vector<1x1x8x8xf32>
    %17 = vector.shape_cast %16 : vector<1x1x8x8xf32> to vector<8x8xf32>
    %18 = vector.shape_cast %15 : vector<8x8xf32> to vector<1x1x8x8xf32>
    tpu.vector_store %arg5[%c0_9, %c0_10, %c0_11, %c0_12], %18 {strides = array<i32>} : memref<1x4x8x8xf32, #tpu.memory_space<vmem>>, vector<1x1x8x8xf32>,
    %c1 = arith.constant 1 : index
    %c0_13 = arith.constant 0 : index
    %c0_14 = arith.constant 0 : index
    %19 = vector.load %arg3[%c1, %c0_13, %c0_14] : memref<4x33x33xf32, #tpu.memory_space<vmem>>, vector<1x33x33xf32>
    %20 = vector.shape_cast %19 : vector<1x33x33xf32> to vector<33x33xf32>
    %21 = vector.extract_strided_slice %20 {offsets = [0, 0], sizes = [32, 33], strides = [1, 1]} : vector<33x33xf32> to vector<32x33xf32>
    %cst_15 = arith.constant dense<0.000000e+00> : vector<8x33xf32>
    %22 = tpu.matmul %1, %21, %cst_15 {dimension_numbers = #tpu.dot_dimension_numbers<[1], [0], [0], [1], [0, 0, 1, 1], [], []>} : vector<8x32xf32>, vector<32x33xf32>, vector<8x33xf32> -> vector<8x33xf32>
    %23 = vector.extract_strided_slice %20 {offsets = [32, 0], sizes = [1, 33], strides = [1, 1]} : vector<33x33xf32> to vector<1x33xf32>
    %24 = vector.broadcast %23 : vector<1x33xf32> to vector<8x33xf32>
    %25 = arith.addf %22, %24 : vector<8x33xf32>
    %26 = vector.extract_strided_slice %25 {offsets = [0, 0], sizes = [8, 32], strides = [1, 1]} : vector<8x33xf32> to vector<8x32xf32>
    %cst_16 = arith.constant dense<0.000000e+00> : vector<8x8xf32>
    %27 = tpu.matmul %26, %3, %cst_16 {dimension_numbers = #tpu.dot_dimension_numbers<[1], [1], [0], [0], [0, 0, 1, 0], [], []>} : vector<8x32xf32>, vector<8x32xf32>, vector<8x8xf32> -> vector<8x8xf32>
    %28 = vector.extract_strided_slice %25 {offsets = [0, 32], sizes = [8, 1], strides = [1, 1]} : vector<8x33xf32> to vector<8x1xf32>
    %29 = vector.broadcast %28 : vector<8x1xf32> to vector<8x8xf32>
    %30 = arith.addf %27, %29 : vector<8x8xf32>
    %c0_17 = arith.constant 0 : index
    %c1_18 = arith.constant 1 : index
    %c0_19 = arith.constant 0 : index
    %c0_20 = arith.constant 0 : index
    %31 = vector.load %arg5[%c0_17, %c1_18, %c0_19, %c0_20] : memref<1x4x8x8xf32, #tpu.memory_space<vmem>>, vector<1x1x8x8xf32>
    %32 = vector.shape_cast %31 : vector<1x1x8x8xf32> to vector<8x8xf32>
    %33 = vector.shape_cast %30 : vector<8x8xf32> to vector<1x1x8x8xf32>
    tpu.vector_store %arg5[%c0_17, %c1_18, %c0_19, %c0_20], %33 {strides = array<i32>} : memref<1x4x8x8xf32, #tpu.memory_space<vmem>>, vector<1x1x8x8xf32>,
    %c2 = arith.constant 2 : index
    %c0_21 = arith.constant 0 : index
    %c0_22 = arith.constant 0 : index
    %34 = vector.load %arg3[%c2, %c0_21, %c0_22] : memref<4x33x33xf32, #tpu.memory_space<vmem>>, vector<1x33x33xf32>
    %35 = vector.shape_cast %34 : vector<1x33x33xf32> to vector<33x33xf32>
    %36 = vector.extract_strided_slice %35 {offsets = [0, 0], sizes = [32, 33], strides = [1, 1]} : vector<33x33xf32> to vector<32x33xf32>
    %cst_23 = arith.constant dense<0.000000e+00> : vector<8x33xf32>
    %37 = tpu.matmul %1, %36, %cst_23 {dimension_numbers = #tpu.dot_dimension_numbers<[1], [0], [0], [1], [0, 0, 1, 1], [], []>} : vector<8x32xf32>, vector<32x33xf32>, vector<8x33xf32> -> vector<8x33xf32>
    %38 = vector.extract_strided_slice %35 {offsets = [32, 0], sizes = [1, 33], strides = [1, 1]} : vector<33x33xf32> to vector<1x33xf32>
    %39 = vector.broadcast %38 : vector<1x33xf32> to vector<8x33xf32>
    %40 = arith.addf %37, %39 : vector<8x33xf32>
    %41 = vector.extract_strided_slice %40 {offsets = [0, 0], sizes = [8, 32], strides = [1, 1]} : vector<8x33xf32> to vector<8x32xf32>
    %cst_24 = arith.constant dense<0.000000e+00> : vector<8x8xf32>
    %42 = tpu.matmul %41, %3, %cst_24 {dimension_numbers = #tpu.dot_dimension_numbers<[1], [1], [0], [0], [0, 0, 1, 0], [], []>} : vector<8x32xf32>, vector<8x32xf32>, vector<8x8xf32> -> vector<8x8xf32>
    %43 = vector.extract_strided_slice %40 {offsets = [0, 32], sizes = [8, 1], strides = [1, 1]} : vector<8x33xf32> to vector<8x1xf32>
    %44 = vector.broadcast %43 : vector<8x1xf32> to vector<8x8xf32>
    %45 = arith.addf %42, %44 : vector<8x8xf32>
    %c0_25 = arith.constant 0 : index
    %c2_26 = arith.constant 2 : index
    %c0_27 = arith.constant 0 : index
    %c0_28 = arith.constant 0 : index
    %46 = vector.load %arg5[%c0_25, %c2_26, %c0_27, %c0_28] : memref<1x4x8x8xf32, #tpu.memory_space<vmem>>, vector<1x1x8x8xf32>
    %47 = vector.shape_cast %46 : vector<1x1x8x8xf32> to vector<8x8xf32>
    %48 = vector.shape_cast %45 : vector<8x8xf32> to vector<1x1x8x8xf32>
    tpu.vector_store %arg5[%c0_25, %c2_26, %c0_27, %c0_28], %48 {strides = array<i32>} : memref<1x4x8x8xf32, #tpu.memory_space<vmem>>, vector<1x1x8x8xf32>,
    %c3 = arith.constant 3 : index
    %c0_29 = arith.constant 0 : index
    %c0_30 = arith.constant 0 : index
    %49 = vector.load %arg3[%c3, %c0_29, %c0_30] : memref<4x33x33xf32, #tpu.memory_space<vmem>>, vector<1x33x33xf32>
    %50 = vector.shape_cast %49 : vector<1x33x33xf32> to vector<33x33xf32>
    %51 = vector.extract_strided_slice %50 {offsets = [0, 0], sizes = [32, 33], strides = [1, 1]} : vector<33x33xf32> to vector<32x33xf32>
    %cst_31 = arith.constant dense<0.000000e+00> : vector<8x33xf32>
    %52 = tpu.matmul %1, %51, %cst_31 {dimension_numbers = #tpu.dot_dimension_numbers<[1], [0], [0], [1], [0, 0, 1, 1], [], []>} : vector<8x32xf32>, vector<32x33xf32>, vector<8x33xf32> -> vector<8x33xf32>
    %53 = vector.extract_strided_slice %50 {offsets = [32, 0], sizes = [1, 33], strides = [1, 1]} : vector<33x33xf32> to vector<1x33xf32>
    %54 = vector.broadcast %53 : vector<1x33xf32> to vector<8x33xf32>
    %55 = arith.addf %52, %54 : vector<8x33xf32>
    %56 = vector.extract_strided_slice %55 {offsets = [0, 0], sizes = [8, 32], strides = [1, 1]} : vector<8x33xf32> to vector<8x32xf32>
    %cst_32 = arith.constant dense<0.000000e+00> : vector<8x8xf32>
    %57 = tpu.matmul %56, %3, %cst_32 {dimension_numbers = #tpu.dot_dimension_numbers<[1], [1], [0], [0], [0, 0, 1, 0], [], []>} : vector<8x32xf32>, vector<8x32xf32>, vector<8x8xf32> -> vector<8x8xf32>
    %58 = vector.extract_strided_slice %55 {offsets = [0, 32], sizes = [8, 1], strides = [1, 1]} : vector<8x33xf32> to vector<8x1xf32>
    %59 = vector.broadcast %58 : vector<8x1xf32> to vector<8x8xf32>
    %60 = arith.addf %57, %59 : vector<8x8xf32>
    %c0_33 = arith.constant 0 : index
    %c3_34 = arith.constant 3 : index
    %c0_35 = arith.constant 0 : index
    %c0_36 = arith.constant 0 : index
    %61 = vector.load %arg5[%c0_33, %c3_34, %c0_35, %c0_36] : memref<1x4x8x8xf32, #tpu.memory_space<vmem>>, vector<1x1x8x8xf32>
    %62 = vector.shape_cast %61 : vector<1x1x8x8xf32> to vector<8x8xf32>
    %63 = vector.shape_cast %60 : vector<8x8xf32> to vector<1x1x8x8xf32>
    tpu.vector_store %arg5[%c0_33, %c3_34, %c0_35, %c0_36], %63 {strides = array<i32>} : memref<1x4x8x8xf32, #tpu.memory_space<vmem>>, vector<1x1x8x8xf32>,
    return
  }
  func.func @transform_0(%arg0: i32, %arg1: i32) -> (i32, i32, i32) {
    %c0_i32 = arith.constant 0 : i32
    %c0_i32_0 = arith.constant 0 : i32
    return %arg0, %arg1, %c0_i32 : i32, i32, i32
  }
  func.func @transform_1(%arg0: i32, %arg1: i32) -> (i32, i32, i32) {
    %c0_i32 = arith.constant 0 : i32
    %c0_i32_0 = arith.constant 0 : i32
    %c0_i32_1 = arith.constant 0 : i32
    %c0_i32_2 = arith.constant 0 : i32
    return %c0_i32, %c0_i32_0, %c0_i32_1 : i32, i32, i32
  }
  func.func @transform_2(%arg0: i32, %arg1: i32) -> (i32, i32, i32) {
    %c0_i32 = arith.constant 0 : i32
    %c0_i32_0 = arith.constant 0 : i32
    %c0_i32_1 = arith.constant 0 : i32
    return %arg0, %c0_i32, %c0_i32_0 : i32, i32, i32
  }
  func.func @transform_3(%arg0: i32, %arg1: i32) -> (i32, i32, i32, i32) {
    %c0_i32 = arith.constant 0 : i32
    %c0_i32_0 = arith.constant 0 : i32
    %c0_i32_1 = arith.constant 0 : i32
    return %arg0, %c0_i32, %arg1, %c0_i32_0 : i32, i32, i32, i32
  }
}

</mosaic_0001>

<bundles_post_ra>
// kernel: tpu_custom_call.1
= control target key start
LH: loop header
LB: loop body
LE: loop exit
PB: predicated region body
PF: predicated region fallthrough
CT: control target
= control target key end

     0   :  { %8 = vsyncpa [#allocation3], 0  ;;  %s1527_s0 = inlined_call_operand.vmem [shape: f32[2,8,32], index: 0, kind: input, shape index: {}]   ;;  %s1528_s1 = inlined_call_operand.vmem [shape: f32[4,33,33], index: 1, kind: input, shape index: {}]   ;;  %s1529_s2 = inlined_call_operand.vmem [shape: f32[2,8,32], index: 2, kind: input, shape index: {}]   ;;  %s1530_s3 = inlined_call_operand.hbm [shape: f32[2,4,8,8], index: 3, kind: output, shape index: {}]  }
   0x1   :  { %10 = vsyncpa [#allocation3 + $0x1], 0  ;;  %s1288_s12 = smov 0   ;;  %s1290_s13 = smov 0  }
   0x2   :  { %s1292_s14 = smov 0   ;;  %s1294_s15 = smov 0  }
   0x3   :  { %s1296_s16 = smov 0   ;;  %s1298_s17 = smov 0  }
   0x4 LB: > { %s954_s18 = sadd.s32 4294967295, %s1259_s17   ;;  %s955_s19 = sadd.s32 4294967294, %s1259_s17   ;;  %s1259_s17 = sphi %s1298_s17, %s16_s17   ;;  %s1255_s16 = sphi %s1296_s16, %s1537_s16   ;;  %s1251_s15 = sphi %s1294_s15, %s1536_s15   ;;  %s1247_s14 = sphi %s1292_s14, %s1535_s14   ;;  %s1243_s13 = sphi %s1290_s13, %s1534_s13   ;;  %s1239_s12 = sphi %s1288_s12, %s1533_s12  }
   0x5   : > { %s28_s20 = sadd.s32 1, %s1255_s16  ;;  %s112_s21 = sadd.s32 1, %s1247_s14 }
   0x6   : > { %p30_p0 = scmp.ge.s32.totalorder %s28_s20, 2  ;;  %p122_p1 = scmp.ne.s32.totalorder %s1247_s14, %s1243_s13 }
   0x7   : > { %p123_p2 = scmp.eq.s32.totalorder %s954_s18, 1  ;;  %p128_p3 = scmp.ne.s32.totalorder %s1243_s13, %s1239_s12 }
   0x8   : > { %s1539_s20 = smov (%p30_p0, %s28_s20), 0  ;;  %p129_p5 = scmp.eq.s32.totalorder %s955_s19, 1 }
   0x9   : > { %p1328_p4 = por %p123_p2, %p122_p1  ;;  %s107_s23 = ssub.s32 %s1255_s16, %s1539_s20 }
   0xa   : > { %p958_p6 = scmp.ge.s32.totalorder %s1259_s17, 1  ;;  %p110_p7 = scmp.eq.s32.totalorder %s107_s23, 0 }
   0xb   : > { %p1335_p8 = por %p129_p5, %p128_p3  ;;  %p167_p9 = scmp.lt.s32.totalorder %s1259_s17, 3 }
   0xc   : > { %s1341_s25 = scalar_select %p110_p7, %s1247_s14, %s112_s21  }
   0xd   : > { %p168_p10 = pnand %p958_p6, %p167_p9 }
   0xe   : > { %v210_v0 = vld [vmem:[%s1528_s1] sm:$0xff] (!%p168_p10)  ;;  %v211_v1 = vld [vmem:[%s1528_s1 + $0x8] sm:$0xff] (!%p168_p10)  ;;  %v212_v2 = vld [vmem:[%s1528_s1 + $0x10] sm:$0xff] (!%p168_p10)  ;;  %v1261_v3 = vmov (!%p168_p10), 0.0|0.0   ;;  %vm1262_vm0 = vmmov (!%p168_p10), 0   ;;  %v1263_v6 = vmov (!%p168_p10), 0.0  }
   0xf   : > { %171 = sbr.rel (%p168_p10) target bundleno = 1136 (0x470), region = 32  ;;  %1094 = vmatprep.subr.bf16.mxu0 (!%p168_p10), %v1261_v3  ;;  %v1095_v4 = vpack.c.bf16 (!%p168_p10), %v211_v1, %v210_v0  ;;  %v213_v5 = vld [vmem:[%s1528_s1 + $0x18] sm:$0xff] (!%p168_p10)  ;;  %1038 = vmatprep.mubr.msk.f32.mxu0 (!%p168_p10), %vm1262_vm0, %v1263_v6  ;;  %p197_p11 = scmp.lt.s32.totalorder (!%p168_p10), %s1251_s15, 1  ;;  %vm219_vm1 = vcmask (!%p168_p10), 261120   ;;  %v1264_v10 = vmov (!%p168_p10), 32   ;;  %v966_v11 = vld [vmem:[%s1528_s1 + $0x28] sm:$0xff] (!%p168_p10) }
  0x10   : > { %1041 = vmatprep.subr.mxu1 (!%p168_p10), %v1263_v6  ;;  %1043 = vmatprep.mubr.msk.f32.mxu1 (!%p168_p10), %vm1262_vm0, %v1263_v6  ;;  %v1098_v7 = vpack.c.bf16 (!%p168_p10), %v213_v5, %v212_v2  ;;  %v967_v12 = vld [vmem:[%s1528_s1 + $0x30] sm:$0xff] (!%p168_p10)  ;;  %v962_v13 = vld [vmem:[%s1528_s1 + $0x20] ss:$0 sm:$0xff] (!%p168_p10)  ;;  %v968_v18 = vld [vmem:[%s1528_s1 + $0x38] sm:$0xff] (!%p168_p10)  ;;  %vm373_vm2 = vcmask (!%p168_p10), 64512   ;;  %s1001_s29 = sshll.u32 (!%p168_p10), %s1251_s15, 9 }
  0x11   : > { %1096 = vmatpush3.bf16.msra.mxu0 (!%p168_p10), %v1095_v4  ;;  %1179 = vset.pattern.permute.xlu0 (!%p168_p10), %v1264_v10  ;;  %v1101_v15 = vpack.c.bf16 (!%p168_p10), %v967_v12, %v966_v11  ;;  %v969_v19 = vld [vmem:[%s1528_s1 + $0x40] sm:$0xff] (!%p168_p10)  ;;  %v976_v25 = vld [vmem:[%s1528_s1 + $0x50] sm:$0xff] (!%p168_p10)  ;;  %v977_v26 = vld [vmem:[%s1528_s1 + $0x58] sm:$0xff] (!%p168_p10)  ;;  %s1475_s5 = scalar_lea.hbm (!%p168_p10), %s1530_s3, %s1001_s29 }
  0x12   : > { %1097 = vmatprep.subr.bf16.mxu0 (!%p168_p10), %v1261_v3  ;;  %1180 = vset.pattern.permute.xlu1 (!%p168_p10), %v1264_v10  ;;  %v1104_v20 = vpack.c.bf16 (!%p168_p10), %v969_v19, %v968_v18  ;;  %v971_v27 = vld [vmem:[%s1528_s1 + $0x48] ss:$0 sm:$0xff] (!%p168_p10)  ;;  %v1107_v29 = vpack.c.bf16 (!%p168_p10), %v977_v26, %v976_v25  ;;  %v978_v32 = vld [vmem:[%s1528_s1 + $0x60] sm:$0xff] (!%p168_p10)  ;;  %v986_v39 = vld [vmem:[%s1528_s1 + $0x78] sm:$0xff] (!%p168_p10) }
  0x13   : > { %v979_v33 = vld [vmem:[%s1528_s1 + $0x68] sm:$0xff] (!%p168_p10)  ;;  %v987_v40 = vld [vmem:[%s1528_s1 + $0x80] sm:$0xff] (!%p168_p10)  ;;  %v981_v41 = vld [vmem:[%s1528_s1 + $0x70] ss:$0 sm:$0xff] (!%p168_p10) }
  0x14   : > { %v1110_v34 = vpack.c.bf16 (!%p168_p10), %v979_v33, %v978_v32  ;;  %v1113_v43 = vpack.c.bf16 (!%p168_p10), %v987_v40, %v986_v39  ;;  %v988_v46 = vld [vmem:[%s1528_s1 + $0x88] sm:$0xff] (!%p168_p10)  ;;  %v989_v47 = vld [vmem:[%s1528_s1 + $0x90] sm:$0xff] (!%p168_p10)  ;;  %v991_v53 = vld [vmem:[%s1528_s1 + $0x98] ss:$0 sm:$0xff] (!%p168_p10) }
  0x15   : > { %1099 = vmatpush3.bf16.msra.mxu0 (!%p168_p10), %v1098_v7  ;;  %v1116_v48 = vpack.c.bf16 (!%p168_p10), %v989_v47, %v988_v46 }
  0x16   : > { %s198_s7 = scalar_select %p197_p11, %s1251_s15, 1  ;;  %1057 = vmatprep.subr.mxu0 %v1263_v6 }
  0x18   : > { %s960_s8 = sshll.u32 %s198_s7, 3  ;;  %s1265_s7 = smov [#allocation2]  }
  0x19   : > { %s203_s11 = scalar_lea.vmem %s1527_s0, %s960_s8  ;;  %s207_s21 = scalar_lea.vmem %s1529_s2, %s960_s8 }
  0x1a   : > { %v1370_v8 = vld [vmem:[%s203_s11] sm:$0xff]  ;;  %s194_s8 = sand.u32 1, %s1243_s13  }
  0x1b   : > { %v209_v9 = vld [vmem:[%s207_s21] sm:$0xff]  ;;  %1039 = vmatmul.mubr.msk.f32.vlgmr.msra.gmra.mrb[0].mxu0 %vm219_vm1, %v1370_v8  ;;  %s959_s9 = sshll.u32 %s194_s8, 5  ;;  %s1481_s6 = scalar_lea.sflag [#allocation3], %s194_s8 }
  0x1c   : > { %1042 = vmatpush3.xpose.msk.msra.mxu1 %vm219_vm1, %v209_v9  ;;  %1059 = vmatprep.mubr.msk.f32.mxu0 %vm1262_vm0, %v1263_v6  ;;  %s1410_s10 = scalar_lea.vmem [#allocation2], %s959_s9  ;;  %s1185_s9 = sshll.u32 %s1265_s7, 4  ;;  %s1186_s9 = int_to_ptr.vmem [resolvable:$false] %s1185_s9 }
  0x1d   : > { %1100 = vmatprep.subr.bf16.mxu1 %v1261_v3  ;;  %s867_s28 = sshll.u32 %s1410_s10, 4  ;;  %s1187_s11 = scalar_lea.vmem %s1186_s9, 1024  ;;  %s1470_s28 = int_to_ptr.vmem [resolvable:$true] %s867_s28 }
  0x1e   : > { %1058 = vmatpush3.xpose.msk.msra.mxu0 %vm219_vm1, %v209_v9  ;;  %s1181_s15 = scalar_lea.vmem %s1470_s28, 512  ;;  %p1188_p1 = scmp.lt.s32.totalorder %s1470_s28, %s1186_s9 }
  0x1f   : > { %1106 = vmatprep.subr.bf16.mxu0 %v1261_v3  ;;  %p1182_p12 = scmp.ne.s32.totalorder %s1470_s28, %s1181_s15  ;;  %p1189_p2 = scmp.lt.s32.totalorder %s1187_s11, %s1181_s15 }
  0x21   : > { %p1183_p13 = pnand %p1182_p12, %p1328_p4  ;;  %p1190_p3 = por %p1189_p2, %p1188_p1 }
  0x23   : > { %p1184_p0 = pneg %p1183_p13 }
  0x25   : > { %p1191_p5 = pnand %p1190_p3, %p1184_p0 }
  0xee   : > { %v289_v14 = vpop.f32.mrb[0].mxu0 }
  0xef   : > { %v290_v16 = vadd.f32 %v962_v13, %v289_v14  ;;  %v1040_v17 = vpop.f32.mrb[1].mxu0 }
  0xf1   : > { %295 = vperm.xlu0 %1179, %v290_v16   ;;  %1044 = vmatmul.mubr.msk.f32.vlgmr.msra.gmra.mrb[0].mxu1 %vm219_vm1, %v290_v16 }
  0xf2   : > { %1102 = vmatpush3.bf16.msra.mxu1 %v1101_v15  ;;  %1054 = vmatprep.mubr.msk.f32.mxu1 %vm1262_vm0, %v1263_v6 }
  0xf3   : > { %1103 = vmatprep.subr.bf16.mxu1 %v1261_v3 }
  0xf6   : > { %1105 = vmatpush3.bf16.msra.mxu1 %v1104_v20 }
  0xf7   : > { %1073 = vmatprep.subr.mxu1 %v1263_v6 }
  0xf9   : > { %1055 = vmatmul.mubr.msk.f32.vlgmr.msra.gmra.mrb[2].mxu1 %vm219_vm1, %v1370_v8 }
  0xfa   : > { %1075 = vmatprep.mubr.msk.f32.mxu1 %vm1262_vm0, %v1263_v6 }
  0xff   : > { %1074 = vmatpush3.xpose.msk.msra.mxu1 %vm219_vm1, %v209_v9 }
 0x100   : > { %1112 = vmatprep.subr.bf16.mxu1 %v1261_v3 }
 0x170   : > { %v296_v21 = vpop.permute.xlu0 %295 }
 0x1c4   : > { %v369_v22 = vpop.f32.mrb[0].mxu1 }
 0x1c5   : > { %v370_v23 = vadd.f32 %v369_v22, %v296_v21  ;;  %v1045_v24 = vpop.f32.mrb[1].mxu1 }
 0x1c7   : > { %374 = vst.msk [vmem:[%s1410_s10] sm:$0xff] %vm373_vm2, %v370_v23 }
 0x1cc   : > { %v451_v28 = vpop.f32.mrb[2].mxu1 }
 0x1cd   : > { %v452_v30 = vadd.f32 %v971_v27, %v451_v28  ;;  %v1056_v31 = vpop.f32.mrb[3].mxu1 }
 0x1cf   : > { %457 = vperm.xlu0 %1179, %v452_v30   ;;  %1060 = vmatmul.mubr.msk.f32.vlgmr.msra.gmra.mrb[2].mxu0 %vm219_vm1, %v452_v30 }
 0x1d0   : > { %1108 = vmatpush3.bf16.msra.mxu0 %v1107_v29  ;;  %1070 = vmatprep.mubr.msk.f32.mxu0 %vm1262_vm0, %v1263_v6 }
 0x1d1   : > { %1109 = vmatprep.subr.bf16.mxu0 %v1261_v3 }
 0x1d4   : > { %1111 = vmatpush3.bf16.msra.mxu0 %v1110_v34 }
 0x1d5   : > { %1089 = vmatprep.subr.mxu0 %v1263_v6 }
 0x1d7   : > { %1071 = vmatmul.mubr.msk.f32.vlgmr.msra.gmra.mrb[4].mxu0 %vm219_vm1, %v1370_v8 }
 0x1d8   : > { %1091 = vmatprep.mubr.msk.f32.mxu0 %vm1262_vm0, %v1263_v6 }
 0x1dd   : > { %1090 = vmatpush3.xpose.msk.msra.mxu0 %vm219_vm1, %v209_v9 }
 0x24e   : > { %v458_v35 = vpop.permute.xlu0 %457 }
 0x2a2   : > { %v528_v36 = vpop.f32.mrb[2].mxu0 }
 0x2a3   : > { %v529_v37 = vadd.f32 %v528_v36, %v458_v35  ;;  %v1061_v38 = vpop.f32.mrb[3].mxu0 }
 0x2a5   : > { %975 = vst.msk [vmem:[%s1410_s10 + $0x8] sm:$0xff] %vm373_vm2, %v529_v37 }
 0x2aa   : > { %v610_v42 = vpop.f32.mrb[4].mxu0 }
 0x2ab   : > { %v611_v44 = vadd.f32 %v981_v41, %v610_v42  ;;  %v1072_v45 = vpop.f32.mrb[5].mxu0 }
 0x2ad   : > { %616 = vperm.xlu1 %1180, %v611_v44   ;;  %1076 = vmatmul.mubr.msk.f32.vlgmr.msra.gmra.mrb[4].mxu1 %vm219_vm1, %v611_v44 }
 0x2ae   : > { %1114 = vmatpush3.bf16.msra.mxu1 %v1113_v43  ;;  %1086 = vmatprep.mubr.msk.f32.mxu1 %vm1262_vm0, %v1263_v6 }
 0x2af   : > { %1115 = vmatprep.subr.bf16.mxu1 %v1261_v3 }
 0x2b2   : > { %1117 = vmatpush3.bf16.msra.mxu1 %v1116_v48 }
 0x2b5   : > { %1087 = vmatmul.mubr.msk.f32.vlgmr.msra.gmra.mrb[6].mxu1 %vm219_vm1, %v1370_v8 }
 0x32c   : > { %v617_v49 = vpop.permute.xlu1 %616 }
 0x380   : > { %v687_v50 = vpop.f32.mrb[4].mxu1 }
 0x381   : > { %v688_v51 = vadd.f32 %v687_v50, %v617_v49  ;;  %v1077_v52 = vpop.f32.mrb[5].mxu1 }
 0x383   : > { %985 = vst.msk [vmem:[%s1410_s10 + $0x10] sm:$0xff] %vm373_vm2, %v688_v51 }
 0x388   : > { %v769_v54 = vpop.f32.mrb[6].mxu1 }
 0x389   : > { %v770_v55 = vadd.f32 %v991_v53, %v769_v54  ;;  %v1088_v56 = vpop.f32.mrb[7].mxu1 }
 0x38b   : > { %775 = vperm.xlu1 %1180, %v770_v55   ;;  %1092 = vmatmul.mubr.msk.f32.vlgmr.msra.gmra.mrb[6].mxu0 %vm219_vm1, %v770_v55 }
 0x40a   : > { %v776_v57 = vpop.permute.xlu1 %775 }
 0x45e   : > { %v846_v58 = vpop.f32.mrb[6].mxu0 }
 0x45f   : > { %v847_v59 = vadd.f32 %v846_v58, %v776_v57  ;;  %v1093_v60 = vpop.f32.mrb[7].mxu0 }
 0x461   : > { %995 = vst.msk [vmem:[%s1410_s10 + $0x18] sm:$0xff] %vm373_vm2, %v847_v59 }
 0x462   : > { %1194 = shalt.err (!%p1191_p5)
}
 0x463   : > { %s1195_s8 = scalar_lea.hbm %s1475_s5, 512  ;;  %s1199_s19 = scalar_lea.hbm %s1530_s3, 1024 }
 0x464   : > { %p1196_p6 = scmp.ne.s32.totalorder %s1475_s5, %s1195_s8  ;;  %p1200_p10 = scmp.lt.u32.totalorder %s1475_s5, %s1530_s3 }
 0x465   : > { %p1201_p11 = scmp.lt.u32.totalorder %s1199_s19, %s1195_s8  ;;  %p1203_p13 = scmp.lt.u32.totalorder %s1195_s8, %s1475_s5 }
 0x466   : > { %p1197_p7 = pnand %p1196_p6, %p1328_p4 }
 0x467   : > { %p1202_p12 = por %p1201_p11, %p1200_p10 }
 0x468   : > { %p1198_p9 = pneg %p1197_p7 }
 0x469   : > { %p1204_p0 = por %p1203_p13, %p1202_p12 }
 0x46b   : > { %p1205_p1 = pnand %p1204_p0, %p1198_p9 }
 0x46d   : > { %1208 = shalt.err (!%p1205_p1)
}
 0x46e   : > { %s1266_s26 = smov 128   ;;  %s1267_s27 = smov 8  }
 0x46f   : > { %1118 = dma.vmem_to_hbm [thread:$0]  (%p1328_p4), %s1470_s28, 512, %s1475_s5, %s1481_s6, %s1266_s26, %s1266_s26, %s1267_s27  }
 0x470 PF: > { %p1124_p2 = scmp.ge.s32.totalorder %s1259_s17, 2  ;;  %s882_s29 = sand.u32 1, %s1239_s12  }
 0x471   : > { %s883_s30 = scalar_lea.sflag [#allocation3], %s882_s29 }
 0x472   : > { %p1121_p3 = pnand %p1124_p2, %p1335_p8 }
 0x474   : > { %1234 = dma.done.wait (!%p1121_p3), %s883_s30, 512  }
 0x475   : > { %1236 = vsyncadd (!%p1121_p3), %s883_s30, 4294966784  ;;  %s16_s17 = sadd.s32 1, %s1259_s17   ;;  %s1533_s12 = smov %s1243_s13 }
 0x476   : > { %p13_p5 = scmp.ge.s32.totalorder %s16_s17, 4   ;;  %s1534_s13 = smov %s1247_s14 }
 0x477   : > { %s1535_s14 = smov %s1341_s25  ;;  %s1536_s15 = smov %s1255_s16 }
 0x478   : > { %s1537_s16 = smov %s1539_s20  ;;  %15 = sbr.rel (!%p13_p5) target bundleno = 4 (0x4), region = 76 }
 0x47f   :  { %888 = vsyncpa [#allocation3], 1 }
 0x480   :  { %890 = vsyncpa [#allocation3 + $0x1], 1 }

</bundles_post_ra>
